<compile_context>
chip_gen: v7x
topology: tpu7x:2x2x1
jax: 0.10.0
libtpu: 0.0.40
codegen_flags: <defaults>
</compile_context>

<pallas_src>
import jax
import jax.numpy as jnp
from jax.experimental import pallas as pl
from jax.experimental.pallas import tpu as pltpu

# ---------------- configuration (small, TPU-friendly shapes) ----------------
B = 2                 # batch
C_IN = 3              # input image channels
H = W = 16            # spatial
KH = KW = 3           # conv stem kernel
P = H * W             # spatial positions per image (256)
K_RAW = C_IN * KH * KW  # 27 (im2col contraction)
K_PAD = 128           # lane-aligned contraction; col K_RAW carries the bias
FEAT = 128            # backbone feature channels (stand-in for densenet's 1024)
N_META = 8            # n_meta_features
META_DIM = (32, 16)   # n_meta_dim (stand-in for [512, 128])
N_LABELS = 5
LBL_PAD = 128         # lane-dense output width; sliced to N_LABELS in wrapper
EPS = 1e-5


# ---------------------------- glue: im2col ----------------------------------
def im2col(x):
    """x: [B, C, H, W] -> [B*P, K_RAW] (SAME padding, stride 1)."""
    b, c, h, w = x.shape
    xp = jnp.pad(x, ((0, 0), (0, 0), (1, 1), (1, 1)))
    cols = []
    for di in range(KH):
        for dj in range(KW):
            cols.append(xp[:, :, di:di + h, dj:dj + w])   # [B, C, H, W]
    p = jnp.stack(cols, axis=2)                           # [B, C, KH*KW, H, W]
    p = p.reshape(b, c * KH * KW, h * w)                  # [B, K, P]
    return jnp.transpose(p, (0, 2, 1)).reshape(b * h * w, c * KH * KW)


def im2col_padded(x):
    """[B*P, K_PAD]: cols 0..26 patch values, col 27 == 1.0 (bias), rest 0."""
    p = im2col(x)                                         # [B*P, 27]
    rows = p.shape[0]
    ones = jnp.ones((rows, 1), p.dtype)
    zeros = jnp.zeros((rows, K_PAD - K_RAW - 1), p.dtype)
    return jnp.concatenate([p, ones, zeros], axis=1)      # [B*P, 128]


# ------------------------ fused single-grid-point kernel ---------------------
def fused_kernel(patches_ref, wconv_ref, xmeta_ref,
                 w1_ref, w2_ref, bias_ref, wfi_ref, wfm_ref, out_ref):
    D0, D1 = META_DIM

    def sigmoid(v):                       # EUP tanh instead of VPU divide
        return 0.5 * (jnp.tanh(0.5 * v) + 1.0)

    # --- backbone stand-in: conv (im2col matmul, bias folded) + ReLU + GAP ---
    feat = jnp.dot(patches_ref[...], wconv_ref[...],
                   preferred_element_type=jnp.float32)     # [B*P, FEAT]
    feat = jnp.maximum(feat, 0.0)                          # F.relu
    # adaptive_avg_pool2d((1,1)) per batch element (static slices, B unrolled)
    pooled = jnp.concatenate(
        [jnp.mean(feat[b * P:(b + 1) * P, :], axis=0, keepdims=True)
         for b in range(B)],
        axis=0)                                            # [B, FEAT]

    # --- meta MLP: Linear (BN folded) -> Swish, twice; dropouts are identity -
    bias = bias_ref[...]                                   # (3, LBL_PAD)
    c1 = bias[0:1, 0:D0]
    c2 = bias[1:2, 0:D1]
    bfc = bias[2:3, :]
    h = jnp.dot(xmeta_ref[...], w1_ref[...],
                preferred_element_type=jnp.float32) + c1
    h = h * sigmoid(h)                                     # Swish
    h = jnp.dot(h, w2_ref[...],
                preferred_element_type=jnp.float32) + c2
    h = h * sigmoid(h)                                     # Swish

    # --- cat((x, x_meta), dim=1) @ myfc == split-weight matmul; the 5
    #     eval-mode dropout heads average to the identity -> write once ------
    out_ref[...] = (jnp.dot(pooled, wfi_ref[...], preferred_element_type=jnp.float32)
                    + jnp.dot(h, wfm_ref[...], preferred_element_type=jnp.float32)
                    + bfc)


def meta_cxr_forward(x, x_meta, kp):
    patches = im2col_padded(x)                             # plain-JAX glue
    args = (patches, kp["w_conv"], x_meta, kp["w1"], kp["w2"],
            kp["bias_pack"], kp["wfc_img"], kp["wfc_meta"])
    # note n=a.ndim default arg: avoids late-binding of the loop variable
    in_specs = [pl.BlockSpec(a.shape, lambda i, n=a.ndim: (0,) * n)
                for a in args]
    out = pl.pallas_call(
        fused_kernel,
        out_shape=jax.ShapeDtypeStruct((B, LBL_PAD), jnp.float32),
        grid=(1,),
        in_specs=in_specs,
        out_specs=pl.BlockSpec((B, LBL_PAD), lambda i: (0, 0)),
        compiler_params=pltpu.CompilerParams(
            dimension_semantics=("arbitrary",)),
    )(*args)
    return out[:, :N_LABELS]


# ------------------------------ parameters -----------------------------------
def init_params(key):
    """Raw (unfused) parameters, mirroring the PyTorch module layout."""
    ks = jax.random.split(key, 16)
    D0, D1 = META_DIM

    def rnd(k, shape, scale=0.05):
        return scale * jax.random.normal(k, shape, dtype=jnp.float32)

    w_conv = rnd(ks[0], (K_RAW, FEAT))          # conv stem weight [K, F]
    b_conv = rnd(ks[1], (1, FEAT))
    w1 = rnd(ks[2], (N_META, D0)); b1 = rnd(ks[3], (1, D0))
    w2 = rnd(ks[4], (D0, D1));     b2 = rnd(ks[5], (1, D1))
    g1 = 1.0 + rnd(ks[6], (1, D0)); beta1 = rnd(ks[7], (1, D0))
    m1 = rnd(ks[8], (1, D0));       v1 = 1.0 + 0.1 * jnp.abs(rnd(ks[9], (1, D0)))
    g2 = 1.0 + rnd(ks[10], (1, D1)); beta2 = rnd(ks[11], (1, D1))
    m2 = rnd(ks[12], (1, D1));       v2 = 1.0 + 0.1 * jnp.abs(rnd(ks[13], (1, D1)))
    wfc = rnd(ks[14], (FEAT + D1, N_LABELS))    # myfc
    bfc = rnd(ks[15], (1, N_LABELS))
    return dict(w_conv=w_conv, b_conv=b_conv, w1=w1, b1=b1, w2=w2, b2=b2,
                g1=g1, beta1=beta1, m1=m1, v1=v1,
                g2=g2, beta2=beta2, m2=m2, v2=v2, wfc=wfc, bfc=bfc)


def prepare_kernel_params(p):
    """Fold BN / biases / padding into the kernel-side parameter layout."""
    D0, D1 = META_DIM
    # conv: pad contraction axis to 128, fold bias into row K_RAW
    w_conv = jnp.zeros((K_PAD, FEAT), jnp.float32)
    w_conv = w_conv.at[:K_RAW].set(p["w_conv"])
    w_conv = w_conv.at[K_RAW].set(p["b_conv"][0])
    # eval-mode BN folded into the Linear layers
    s1 = p["g1"] / jnp.sqrt(p["v1"] + EPS); t1 = p["beta1"] - p["m1"] * s1
    s2 = p["g2"] / jnp.sqrt(p["v2"] + EPS); t2 = p["beta2"] - p["m2"] * s2
    w1 = p["w1"] * s1
    c1 = p["b1"] * s1 + t1
    w2 = p["w2"] * s2
    c2 = p["b2"] * s2 + t2
    # myfc split into image/meta halves, label axis zero-padded to 128 lanes
    wfc_img = jnp.zeros((FEAT, LBL_PAD), jnp.float32).at[:, :N_LABELS].set(p["wfc"][:FEAT])
    wfc_meta = jnp.zeros((D1, LBL_PAD), jnp.float32).at[:, :N_LABELS].set(p["wfc"][FEAT:])
    # pack the three remaining bias vectors into one (3, 128) array
    bias_pack = jnp.zeros((3, LBL_PAD), jnp.float32)
    bias_pack = bias_pack.at[0, :D0].set(c1[0])
    bias_pack = bias_pack.at[1, :D1].set(c2[0])
    bias_pack = bias_pack.at[2, :N_LABELS].set(p["bfc"][0])
    return dict(w_conv=w_conv, w1=w1, w2=w2, bias_pack=bias_pack,
                wfc_img=wfc_img, wfc_meta=wfc_meta)


# ----------------------------- pure-JAX reference ----------------------------
def reference_forward(x, x_meta, p):
    """Mirrors the PyTorch eval-mode forward with the raw (unfused) params."""
    patches = im2col(x)                                    # [B*P, 27]
    feat = patches @ p["w_conv"] + p["b_conv"]
    feat = jnp.maximum(feat, 0.0)
    pooled = feat.reshape(B, P, FEAT).mean(axis=1)
    s1 = p["g1"] / jnp.sqrt(p["v1"] + EPS); t1 = p["beta1"] - p["m1"] * s1
    s2 = p["g2"] / jnp.sqrt(p["v2"] + EPS); t2 = p["beta2"] - p["m2"] * s2
    h = x_meta @ p["w1"] + p["b1"]
    h = h * s1 + t1
    h = h * jax.nn.sigmoid(h)
    h = h @ p["w2"] + p["b2"]
    h = h * s2 + t2
    h = h * jax.nn.sigmoid(h)
    xc = jnp.concatenate([pooled, h], axis=1)
    return xc @ p["wfc"] + p["bfc"]        # mean of 5 identical dropout heads


if __name__ == "__main__":
    key = jax.random.PRNGKey(0)
    kx, km, kp = jax.random.split(key, 3)
    x = jax.random.normal(kx, (B, C_IN, H, W), dtype=jnp.float32)      # NCHW
    x_meta = jax.random.normal(km, (B, N_META), dtype=jnp.float32)

    params = init_params(kp)
    kparams = prepare_kernel_params(params)

    out = meta_cxr_forward(x, x_meta, kparams)
    out = jax.block_until_ready(out)

    ref = reference_forward(x, x_meta, params)
    assert out.shape == (B, N_LABELS)
    assert jnp.allclose(out, ref, atol=1e-4, rtol=1e-4), (out, ref)

    print("KERNEL_OK")
</pallas_src>

<mosaic_0001>
module attributes {stable_mosaic.version = 11 : i64} {
  func.func @fused_kernel(%arg0: i32, %arg1: memref<512x128xf32, #tpu.memory_space<vmem>>, %arg2: memref<128x128xf32, #tpu.memory_space<vmem>>, %arg3: memref<2x8xf32, #tpu.memory_space<vmem>>, %arg4: memref<8x32xf32, #tpu.memory_space<vmem>>, %arg5: memref<32x16xf32, #tpu.memory_space<vmem>>, %arg6: memref<3x128xf32, #tpu.memory_space<vmem>>, %arg7: memref<128x128xf32, #tpu.memory_space<vmem>>, %arg8: memref<16x128xf32, #tpu.memory_space<vmem>>, %arg9: memref<2x128xf32, #tpu.memory_space<vmem>>) attributes {dimension_semantics = [#tpu.dimension_semantics<arbitrary>], iteration_bounds = array<i64: 1>, scalar_prefetch = 0 : i64, scratch_operands = 0 : i64, tpu.core_type = #tpu.core_type<tc>, window_params = [{pipeline_mode = #tpu.pipeline_mode<synchronous>, transform_indices = @transform_0, window_bounds = array<i64: 512, 128>}, {pipeline_mode = #tpu.pipeline_mode<synchronous>, transform_indices = @transform_1, window_bounds = array<i64: 128, 128>}, {pipeline_mode = #tpu.pipeline_mode<synchronous>, transform_indices = @transform_2, window_bounds = array<i64: 2, 8>}, {pipeline_mode = #tpu.pipeline_mode<synchronous>, transform_indices = @transform_3, window_bounds = array<i64: 8, 32>}, {pipeline_mode = #tpu.pipeline_mode<synchronous>, transform_indices = @transform_4, window_bounds = array<i64: 32, 16>}, {pipeline_mode = #tpu.pipeline_mode<synchronous>, transform_indices = @transform_5, window_bounds = array<i64: 3, 128>}, {pipeline_mode = #tpu.pipeline_mode<synchronous>, transform_indices = @transform_6, window_bounds = array<i64: 128, 128>}, {pipeline_mode = #tpu.pipeline_mode<synchronous>, transform_indices = @transform_7, window_bounds = array<i64: 16, 128>}, {pipeline_mode = #tpu.pipeline_mode<synchronous>, transform_indices = @transform_8, window_bounds = array<i64: 2, 128>}]} {
    %c0 = arith.constant 0 : index
    %c0_0 = arith.constant 0 : index
    %0 = vector.load %arg1[%c0, %c0_0] : memref<512x128xf32, #tpu.memory_space<vmem>>, vector<512x128xf32>
    %c0_1 = arith.constant 0 : index
    %c0_2 = arith.constant 0 : index
    %1 = vector.load %arg2[%c0_1, %c0_2] : memref<128x128xf32, #tpu.memory_space<vmem>>, vector<128x128xf32>
    %cst = arith.constant dense<0.000000e+00> : vector<512x128xf32>
    %2 = tpu.matmul %0, %1, %cst {dimension_numbers = #tpu.dot_dimension_numbers<[1], [0], [0], [1], [0, 0, 1, 1], [], []>} : vector<512x128xf32>, vector<128x128xf32>, vector<512x128xf32> -> vector<512x128xf32>
    %cst_3 = arith.constant 0.000000e+00 : f32
    %3 = vector.broadcast %cst_3 : f32 to vector<512x128xf32>
    %4 = arith.maximumf %2, %3 : vector<512x128xf32>
    %5 = vector.extract_strided_slice %4 {offsets = [0, 0], sizes = [256, 128], strides = [1, 1]} : vector<512x128xf32> to vector<256x128xf32>
    %cst_4 = arith.constant dense<0.000000e+00> : vector<128xf32>
    %6 = vector.multi_reduction <add>, %5, %cst_4 [0] : vector<256x128xf32> to vector<128xf32>
    %7 = vector.shape_cast %6 : vector<128xf32> to vector<1x128xf32>
    %cst_5 = arith.constant 2.560000e+02 : f32
    %8 = vector.broadcast %cst_5 : f32 to vector<1x128xf32>
    %9 = arith.divf %7, %8 : vector<1x128xf32>
    %10 = vector.extract_strided_slice %4 {offsets = [256, 0], sizes = [256, 128], strides = [1, 1]} : vector<512x128xf32> to vector<256x128xf32>
    %cst_6 = arith.constant dense<0.000000e+00> : vector<128xf32>
    %11 = vector.multi_reduction <add>, %10, %cst_6 [0] : vector<256x128xf32> to vector<128xf32>
    %12 = vector.shape_cast %11 : vector<128xf32> to vector<1x128xf32>
    %cst_7 = arith.constant 2.560000e+02 : f32
    %13 = vector.broadcast %cst_7 : f32 to vector<1x128xf32>
    %14 = arith.divf %12, %13 : vector<1x128xf32>
    %15 = tpu.concatenate %9, %14 in 0 : vector<1x128xf32>, vector<1x128xf32> -> vector<2x128xf32>
    %c0_8 = arith.constant 0 : index
    %c0_9 = arith.constant 0 : index
    %16 = vector.load %arg6[%c0_8, %c0_9] : memref<3x128xf32, #tpu.memory_space<vmem>>, vector<3x128xf32>
    %17 = vector.extract_strided_slice %16 {offsets = [0, 0], sizes = [1, 32], strides = [1, 1]} : vector<3x128xf32> to vector<1x32xf32>
    %18 = vector.extract_strided_slice %16 {offsets = [1, 0], sizes = [1, 16], strides = [1, 1]} : vector<3x128xf32> to vector<1x16xf32>
    %19 = vector.extract_strided_slice %16 {offsets = [2, 0], sizes = [1, 128], strides = [1, 1]} : vector<3x128xf32> to vector<1x128xf32>
    %c0_10 = arith.constant 0 : index
    %c0_11 = arith.constant 0 : index
    %20 = vector.load %arg3[%c0_10, %c0_11] : memref<2x8xf32, #tpu.memory_space<vmem>>, vector<2x8xf32>
    %c0_12 = arith.constant 0 : index
    %c0_13 = arith.constant 0 : index
    %21 = vector.load %arg4[%c0_12, %c0_13] : memref<8x32xf32, #tpu.memory_space<vmem>>, vector<8x32xf32>
    %cst_14 = arith.constant dense<0.000000e+00> : vector<2x32xf32>
    %22 = tpu.matmul %20, %21, %cst_14 {dimension_numbers = #tpu.dot_dimension_numbers<[1], [0], [0], [1], [0, 0, 1, 1], [], []>} : vector<2x8xf32>, vector<8x32xf32>, vector<2x32xf32> -> vector<2x32xf32>
    %23 = vector.broadcast %17 : vector<1x32xf32> to vector<2x32xf32>
    %24 = arith.addf %22, %23 : vector<2x32xf32>
    %cst_15 = arith.constant 5.000000e-01 : f32
    %25 = vector.broadcast %cst_15 : f32 to vector<2x32xf32>
    %26 = arith.mulf %25, %24 : vector<2x32xf32>
    %27 = math.tanh %26 : vector<2x32xf32>
    %cst_16 = arith.constant 1.000000e+00 : f32
    %28 = vector.broadcast %cst_16 : f32 to vector<2x32xf32>
    %29 = arith.addf %27, %28 : vector<2x32xf32>
    %cst_17 = arith.constant 5.000000e-01 : f32
    %30 = vector.broadcast %cst_17 : f32 to vector<2x32xf32>
    %31 = arith.mulf %30, %29 : vector<2x32xf32>
    %32 = arith.mulf %24, %31 : vector<2x32xf32>
    %c0_18 = arith.constant 0 : index
    %c0_19 = arith.constant 0 : index
    %33 = vector.load %arg5[%c0_18, %c0_19] : memref<32x16xf32, #tpu.memory_space<vmem>>, vector<32x16xf32>
    %cst_20 = arith.constant dense<0.000000e+00> : vector<2x16xf32>
    %34 = tpu.matmul %32, %33, %cst_20 {dimension_numbers = #tpu.dot_dimension_numbers<[1], [0], [0], [1], [0, 0, 1, 1], [], []>} : vector<2x32xf32>, vector<32x16xf32>, vector<2x16xf32> -> vector<2x16xf32>
    %35 = vector.broadcast %18 : vector<1x16xf32> to vector<2x16xf32>
    %36 = arith.addf %34, %35 : vector<2x16xf32>
    %cst_21 = arith.constant 5.000000e-01 : f32
    %37 = vector.broadcast %cst_21 : f32 to vector<2x16xf32>
    %38 = arith.mulf %37, %36 : vector<2x16xf32>
    %39 = math.tanh %38 : vector<2x16xf32>
    %cst_22 = arith.constant 1.000000e+00 : f32
    %40 = vector.broadcast %cst_22 : f32 to vector<2x16xf32>
    %41 = arith.addf %39, %40 : vector<2x16xf32>
    %cst_23 = arith.constant 5.000000e-01 : f32
    %42 = vector.broadcast %cst_23 : f32 to vector<2x16xf32>
    %43 = arith.mulf %42, %41 : vector<2x16xf32>
    %44 = arith.mulf %36, %43 : vector<2x16xf32>
    %c0_24 = arith.constant 0 : index
    %c0_25 = arith.constant 0 : index
    %45 = vector.load %arg7[%c0_24, %c0_25] : memref<128x128xf32, #tpu.memory_space<vmem>>, vector<128x128xf32>
    %cst_26 = arith.constant dense<0.000000e+00> : vector<2x128xf32>
    %46 = tpu.matmul %15, %45, %cst_26 {dimension_numbers = #tpu.dot_dimension_numbers<[1], [0], [0], [1], [0, 0, 1, 1], [], []>} : vector<2x128xf32>, vector<128x128xf32>, vector<2x128xf32> -> vector<2x128xf32>
    %c0_27 = arith.constant 0 : index
    %c0_28 = arith.constant 0 : index
    %47 = vector.load %arg8[%c0_27, %c0_28] : memref<16x128xf32, #tpu.memory_space<vmem>>, vector<16x128xf32>
    %cst_29 = arith.constant dense<0.000000e+00> : vector<2x128xf32>
    %48 = tpu.matmul %44, %47, %cst_29 {dimension_numbers = #tpu.dot_dimension_numbers<[1], [0], [0], [1], [0, 0, 1, 1], [], []>} : vector<2x16xf32>, vector<16x128xf32>, vector<2x128xf32> -> vector<2x128xf32>
    %49 = arith.addf %46, %48 : vector<2x128xf32>
    %50 = vector.broadcast %19 : vector<1x128xf32> to vector<2x128xf32>
    %51 = arith.addf %49, %50 : vector<2x128xf32>
    %c0_30 = arith.constant 0 : index
    %c0_31 = arith.constant 0 : index
    %52 = vector.load %arg9[%c0_30, %c0_31] : memref<2x128xf32, #tpu.memory_space<vmem>>, vector<2x128xf32>
    tpu.vector_store %arg9[%c0_30, %c0_31], %51 {strides = array<i32>} : memref<2x128xf32, #tpu.memory_space<vmem>>, vector<2x128xf32>,
    return
  }
  func.func @transform_0(%arg0: i32) -> (i32, i32) {
    %c0_i32 = arith.constant 0 : i32
    %c0_i32_0 = arith.constant 0 : i32
    %c0_i32_1 = arith.constant 0 : i32
    return %c0_i32, %c0_i32_0 : i32, i32
  }
  func.func @transform_1(%arg0: i32) -> (i32, i32) {
    %c0_i32 = arith.constant 0 : i32
    %c0_i32_0 = arith.constant 0 : i32
    %c0_i32_1 = arith.constant 0 : i32
    return %c0_i32, %c0_i32_0 : i32, i32
  }
  func.func @transform_2(%arg0: i32) -> (i32, i32) {
    %c0_i32 = arith.constant 0 : i32
    %c0_i32_0 = arith.constant 0 : i32
    %c0_i32_1 = arith.constant 0 : i32
    return %c0_i32, %c0_i32_0 : i32, i32
  }
  func.func @transform_3(%arg0: i32) -> (i32, i32) {
    %c0_i32 = arith.constant 0 : i32
    %c0_i32_0 = arith.constant 0 : i32
    %c0_i32_1 = arith.constant 0 : i32
    return %c0_i32, %c0_i32_0 : i32, i32
  }
  func.func @transform_4(%arg0: i32) -> (i32, i32) {
    %c0_i32 = arith.constant 0 : i32
    %c0_i32_0 = arith.constant 0 : i32
    %c0_i32_1 = arith.constant 0 : i32
    return %c0_i32, %c0_i32_0 : i32, i32
  }
  func.func @transform_5(%arg0: i32) -> (i32, i32) {
    %c0_i32 = arith.constant 0 : i32
    %c0_i32_0 = arith.constant 0 : i32
    %c0_i32_1 = arith.constant 0 : i32
    return %c0_i32, %c0_i32_0 : i32, i32
  }
  func.func @transform_6(%arg0: i32) -> (i32, i32) {
    %c0_i32 = arith.constant 0 : i32
    %c0_i32_0 = arith.constant 0 : i32
    %c0_i32_1 = arith.constant 0 : i32
    return %c0_i32, %c0_i32_0 : i32, i32
  }
  func.func @transform_7(%arg0: i32) -> (i32, i32) {
    %c0_i32 = arith.constant 0 : i32
    %c0_i32_0 = arith.constant 0 : i32
    %c0_i32_1 = arith.constant 0 : i32
    return %c0_i32, %c0_i32_0 : i32, i32
  }
  func.func @transform_8(%arg0: i32) -> (i32, i32) {
    %c0_i32 = arith.constant 0 : i32
    %c0_i32_0 = arith.constant 0 : i32
    %c0_i32_1 = arith.constant 0 : i32
    return %c0_i32, %c0_i32_0 : i32, i32
  }
}

</mosaic_0001>

<bundles_post_ra>
// kernel: tpu_custom_call.1
= control target key start
LH: loop header
LB: loop body
LE: loop exit
PB: predicated region body
PF: predicated region fallthrough
CT: control target
= control target key end

     0   :  { %13 = vsyncpa [#allocation3], 0  ;;  %s1759_s0 = inlined_call_operand.hbm [shape: f32[512,128], index: 0, kind: input, shape index: {}]   ;;  %s1760_s1 = inlined_call_operand.hbm [shape: f32[128,128], index: 1, kind: input, shape index: {}]   ;;  %s1761_s2 = inlined_call_operand.vmem [shape: f32[2,8], index: 2, kind: input, shape index: {}]   ;;  %s1762_s3 = inlined_call_operand.vmem [shape: f32[8,32], index: 3, kind: input, shape index: {}]   ;;  %s1763_s4 = inlined_call_operand.vmem [shape: f32[32,16], index: 4, kind: input, shape index: {}]   ;;  %s1764_s5 = inlined_call_operand.vmem [shape: f32[3,128], index: 5, kind: input, shape index: {}]   ;;  %s1765_s6 = inlined_call_operand.hbm [shape: f32[128,128], index: 6, kind: input, shape index: {}]   ;;  %s1766_s7 = inlined_call_operand.vmem [shape: f32[16,128], index: 7, kind: input, shape index: {}]   ;;  %s1767_s8 = inlined_call_operand.hbm [shape: f32[2,128], index: 8, kind: output, shape index: {}]  }
   0x1   :  { %14 = vsyncpa [#allocation6], 0 }
   0x2   :  { %15 = vsyncpa [#allocation4], 0  ;;  %s1520_s27 = smov [#allocation5]   ;;  %s1521_s29 = smov [#allocation2]  }
   0x3   :  { %s33_s28 = sshll.u32 %s1520_s27, 4  ;;  %s21_s30 = sshll.u32 %s1521_s29, 4  ;;  %s34_s28 = int_to_ptr.vmem [resolvable:$true] %s33_s28  ;;  %s1574_s30 = int_to_ptr.vmem [resolvable:$true] %s21_s30 }
   0x4   :  { %s1426_s11 = scalar_lea.hbm %s1760_s1, 2048 }
   0x5   :  { %p1427_p0 = scmp.ne.s32.totalorder %s1760_s1, %s1426_s11  ;;  %p1430_p1 = scmp.lt.u32.totalorder %s1426_s11, %s1760_s1 }
   0x7   :  { %p1432_p2 = pnand %p1430_p1, %p1427_p0 }
   0x9   :  { %1435 = shalt.err (!%p1432_p2)
}
   0xa   :  { %s1436_s16 = scalar_lea.vmem %s34_s28, 2048  ;;  %p1441_p4 = scmp.lt.s32.totalorder %s34_s28, %s34_s28 }
   0xb   :  { %p1437_p3 = scmp.ne.s32.totalorder %s34_s28, %s1436_s16  ;;  %p1442_p5 = scmp.lt.s32.totalorder %s1436_s16, %s1436_s16 }
   0xd   :  { %p1443_p6 = por %p1442_p5, %p1441_p4 }
   0xf   :  { %p1444_p7 = pnand %p1443_p6, %p1437_p3 }
  0x11   :  { %1447 = shalt.err (!%p1444_p7)
}
  0x12   :  { %s1522_s17 = smov 128   ;;  %s1523_s18 = smov 8  }
  0x13   :  { %39 = dma.hbm_to_vmem [thread:$0]  %s1760_s1, 2048, %s34_s28, [#allocation6], %s1522_s17, %s1522_s17, %s1523_s18  }
  0x14   :  { %s1448_s23 = scalar_lea.hbm %s1759_s0, 8192 }
  0x15   :  { %p1449_p8 = scmp.ne.s32.totalorder %s1759_s0, %s1448_s23  ;;  %p1452_p9 = scmp.lt.u32.totalorder %s1448_s23, %s1759_s0 }
  0x17   :  { %p1454_p10 = pnand %p1452_p9, %p1449_p8 }
  0x19   :  { %1457 = shalt.err (!%p1454_p10)
}
  0x1a   :  { %s1458_s29 = scalar_lea.vmem %s1574_s30, 8192  ;;  %p1463_p12 = scmp.lt.s32.totalorder %s1574_s30, %s1574_s30 }
  0x1b   :  { %p1459_p11 = scmp.ne.s32.totalorder %s1574_s30, %s1458_s29  ;;  %p1464_p13 = scmp.lt.s32.totalorder %s1458_s29, %s1458_s29 }
  0x1d   :  { %p1465_p0 = por %p1464_p13, %p1463_p12 }
  0x1f   :  { %p1466_p1 = pnand %p1465_p0, %p1459_p11 }
  0x21   :  { %1469 = shalt.err (!%p1466_p1)
}
  0x22   :  { %27 = dma.hbm_to_vmem [thread:$0]  %s1759_s0, 8192, %s1574_s30, [#allocation3], %s1522_s17, %s1522_s17, %s1523_s18  }
  0x23   :  { %s1524_s9 = smov [#allocation7]   ;;  %s1470_s13 = scalar_lea.hbm %s1765_s6, 2048 }
  0x24   :  { %s53_s10 = sshll.u32 %s1524_s9, 4  ;;  %p1471_p2 = scmp.ne.s32.totalorder %s1765_s6, %s1470_s13  ;;  %s54_s10 = int_to_ptr.vmem [resolvable:$true] %s53_s10 }
  0x25   :  { %p1474_p3 = scmp.lt.u32.totalorder %s1470_s13, %s1765_s6 }
  0x27   :  { %p1476_p4 = pnand %p1474_p3, %p1471_p2 }
  0x29   :  { %1479 = shalt.err (!%p1476_p4)
}
  0x2a   :  { %s1480_s20 = scalar_lea.vmem %s54_s10, 2048  ;;  %p1485_p6 = scmp.lt.s32.totalorder %s54_s10, %s54_s10 }
  0x2b   :  { %p1481_p5 = scmp.ne.s32.totalorder %s54_s10, %s1480_s20  ;;  %p1486_p7 = scmp.lt.s32.totalorder %s1480_s20, %s1480_s20 }
  0x2d   :  { %p1487_p8 = por %p1486_p7, %p1485_p6 }
  0x2f   :  { %p1488_p9 = pnand %p1487_p8, %p1481_p5 }
  0x31   :  { %1491 = shalt.err (!%p1488_p9)
}
  0x32   :  { %59 = dma.hbm_to_vmem [thread:$0]  %s1765_s6, 2048, %s54_s10, [#allocation6], %s1522_s17, %s1522_s17, %s1523_s18  }
  0x33   :  { %1514 = dma.done.wait [#allocation3], 8192  }
  0x34   :  { %1515 = vsyncadd [#allocation3], 4294959104 }
  0x35   :  { %1516 = dma.done.wait [#allocation6], 4096  }
  0x36   :  { %1517 = vsyncadd [#allocation6], 4294963200  ;;  %v135_v0 = vld [vmem:[#allocation5] sm:$0xff]  ;;  %v136_v1 = vld [vmem:[#allocation5 + $0x8] sm:$0xff]  ;;  %v1525_v28 = vmov 0.0   ;;  %vm1526_vm0 = vmmov 0  }
  0x37   :  { %v137_v2 = vld [vmem:[#allocation5 + $0x10] sm:$0xff]  ;;  %v1332_v3 = vpack.c.bf16 %v136_v1, %v135_v0  ;;  %v138_v4 = vld [vmem:[#allocation5 + $0x18] sm:$0xff]  ;;  %v139_v6 = vld [vmem:[#allocation5 + $0x20] sm:$0xff]  ;;  %vm686_vm1 = vcmask 64512   ;;  %vm773_vm2 = vcmask 261120   ;;  %vm677_vm3 = vcmask 1040384  }
  0x38   :  { %v1336_v5 = vpack.c.bf16 %v138_v4, %v137_v2  ;;  %v140_v7 = vld [vmem:[#allocation5 + $0x28] sm:$0xff]  ;;  %v71_v9 = vld [vmem:[#allocation2] sm:$0xff]  ;;  %v141_v11 = vld [vmem:[#allocation5 + $0x30] sm:$0xff]  ;;  %vm870_vm4 = vcmask 130048  }
  0x39   :  { %1333 = vmatprep.subr.bf16.mxu0 %v1332_v3  ;;  %1397 = vmatprep.subr.bf16.mxu1 %v1332_v3  ;;  %v1340_v8 = vpack.c.bf16 %v140_v7, %v139_v6  ;;  %v115_v10 = vld [vmem:[#allocation2 + $0x160] sm:$0xff]  ;;  %v142_v12 = vld [vmem:[#allocation5 + $0x38] sm:$0xff]  ;;  %v144_v15 = vld [vmem:[#allocation5 + $0x48] sm:$0xff] }
  0x3a   :  { %1335 = vmatpush3.bf16.msra.mxu0 %v1332_v3  ;;  %1405 = vmatpush3.bf16.msra.mxu1 %v1332_v3  ;;  %v1344_v13 = vpack.c.bf16 %v142_v12, %v141_v11  ;;  %v143_v14 = vld [vmem:[#allocation5 + $0x40] sm:$0xff]  ;;  %v145_v17 = vld [vmem:[#allocation5 + $0x50] sm:$0xff]  ;;  %v146_v18 = vld [vmem:[#allocation5 + $0x58] sm:$0xff] }
  0x3b   :  { %1337 = vmatprep.subr.bf16.mxu0 %v1336_v5  ;;  %1398 = vmatprep.subr.bf16.mxu1 %v1336_v5  ;;  %v1348_v16 = vpack.c.bf16 %v144_v15, %v143_v14  ;;  %v1352_v19 = vpack.c.bf16 %v146_v18, %v145_v17  ;;  %v147_v20 = vld [vmem:[#allocation5 + $0x60] sm:$0xff]  ;;  %v148_v21 = vld [vmem:[#allocation5 + $0x68] sm:$0xff]  ;;  %v149_v23 = vld [vmem:[#allocation5 + $0x70] sm:$0xff] }
  0x3c   :  { %1178 = vmatprep.mubr.f32.mxu0 %v71_v9  ;;  %1244 = vmatprep.mubr.f32.mxu1 %v115_v10  ;;  %v1356_v22 = vpack.c.bf16 %v148_v21, %v147_v20  ;;  %v150_v24 = vld [vmem:[#allocation5 + $0x78] sm:$0xff]  ;;  %v72_v26 = vld [vmem:[#allocation2 + $0x8] sm:$0xff]  ;;  %v681_v29 = vld [vmem:[%s1762_s3] sm:$0xff] }
  0x3d   :  { %v1360_v25 = vpack.c.bf16 %v150_v24, %v149_v23  ;;  %v116_v27 = vld [vmem:[#allocation2 + $0x168] sm:$0xff]  ;;  %v73_v30 = vld [vmem:[#allocation2 + $0x10] sm:$0xff]  ;;  %v74_v32 = vld [vmem:[#allocation2 + $0x18] sm:$0xff] }
  0x3e   :  { %1339 = vmatpush3.bf16.msra.mxu0 %v1336_v5  ;;  %1406 = vmatpush3.bf16.msra.mxu1 %v1336_v5  ;;  %v117_v31 = vld [vmem:[#allocation2 + $0x170] sm:$0xff]  ;;  %v118_v33 = vld [vmem:[#allocation2 + $0x178] sm:$0xff]  ;;  %v75_v34 = vld [vmem:[#allocation2 + $0x20] sm:$0xff] }
  0x3f   :  { %1341 = vmatprep.subr.bf16.mxu0 %v1340_v8  ;;  %1399 = vmatprep.subr.bf16.mxu1 %v1340_v8  ;;  %v119_v35 = vld [vmem:[#allocation2 + $0x180] sm:$0xff]  ;;  %v76_v36 = vld [vmem:[#allocation2 + $0x28] sm:$0xff]  ;;  %v77_v38 = vld [vmem:[#allocation2 + $0x30] sm:$0xff] }
  0x40   :  { %v120_v37 = vld [vmem:[#allocation2 + $0x188] sm:$0xff]  ;;  %v121_v39 = vld [vmem:[#allocation2 + $0x190] sm:$0xff]  ;;  %v78_v40 = vld [vmem:[#allocation2 + $0x38] sm:$0xff] }
  0x41   :  { %v122_v41 = vld [vmem:[#allocation2 + $0x198] sm:$0xff]  ;;  %v79_v42 = vld [vmem:[#allocation2 + $0x40] sm:$0xff]  ;;  %v80_v44 = vld [vmem:[#allocation2 + $0x48] sm:$0xff] }
  0x42   :  { %1343 = vmatpush3.bf16.msra.mxu0 %v1340_v8  ;;  %1407 = vmatpush3.bf16.msra.mxu1 %v1340_v8  ;;  %v123_v43 = vld [vmem:[#allocation2 + $0x1a0] sm:$0xff]  ;;  %v124_v45 = vld [vmem:[#allocation2 + $0x1a8] sm:$0xff]  ;;  %v81_v46 = vld [vmem:[#allocation2 + $0x50] sm:$0xff] }
  0x43   :  { %1345 = vmatprep.subr.bf16.mxu0 %v1344_v13  ;;  %1400 = vmatprep.subr.bf16.mxu1 %v1344_v13  ;;  %v125_v47 = vld [vmem:[#allocation2 + $0x1b0] sm:$0xff]  ;;  %v82_v48 = vld [vmem:[#allocation2 + $0x58] sm:$0xff]  ;;  %v83_v50 = vld [vmem:[#allocation2 + $0x60] sm:$0xff] }
  0x44   :  { %v126_v49 = vld [vmem:[#allocation2 + $0x1b8] sm:$0xff]  ;;  %v127_v51 = vld [vmem:[#allocation2 + $0x1c0] sm:$0xff]  ;;  %v84_v52 = vld [vmem:[#allocation2 + $0x68] sm:$0xff] }
  0x45   :  { %v128_v53 = vld [vmem:[#allocation2 + $0x1c8] sm:$0xff]  ;;  %v85_v54 = vld [vmem:[#allocation2 + $0x70] sm:$0xff]  ;;  %v86_v56 = vld [vmem:[#allocation2 + $0x78] sm:$0xff] }
  0x46   :  { %1347 = vmatpush3.bf16.msra.mxu0 %v1344_v13  ;;  %1408 = vmatpush3.bf16.msra.mxu1 %v1344_v13  ;;  %v129_v55 = vld [vmem:[#allocation2 + $0x1d0] sm:$0xff]  ;;  %v130_v57 = vld [vmem:[#allocation2 + $0x1d8] sm:$0xff]  ;;  %v87_v58 = vld [vmem:[#allocation2 + $0x80] sm:$0xff] }
  0x47   :  { %1349 = vmatprep.subr.bf16.mxu0 %v1348_v16  ;;  %1401 = vmatprep.subr.bf16.mxu1 %v1348_v16  ;;  %v131_v59 = vld [vmem:[#allocation2 + $0x1e0] sm:$0xff]  ;;  %v88_v60 = vld [vmem:[#allocation2 + $0x88] sm:$0xff]  ;;  %v89_v62 = vld [vmem:[#allocation2 + $0x90] sm:$0xff] }
  0x48   :  { %v132_v61 = vld [vmem:[#allocation2 + $0x1e8] sm:$0xff]  ;;  %v133_v63 = vld [vmem:[#allocation2 + $0x1f0] sm:$0xff]  ;;  %v90_v0 = vld [vmem:[#allocation2 + $0x98] sm:$0xff] }
  0x49   :  { %v134_v1 = vld [vmem:[#allocation2 + $0x1f8] sm:$0xff]  ;;  %v91_v2 = vld [vmem:[#allocation2 + $0xa0] sm:$0xff]  ;;  %v92_v3 = vld [vmem:[#allocation2 + $0xa8] sm:$0xff] }
  0x4a   :  { %1351 = vmatpush3.bf16.msra.mxu0 %v1348_v16  ;;  %1409 = vmatpush3.bf16.msra.mxu1 %v1348_v16  ;;  %v680_v4 = vld [vmem:[%s1761_s2] sm:$0x3]  ;;  %v93_v5 = vld [vmem:[#allocation2 + $0xb0] sm:$0xff]  ;;  %v94_v6 = vld [vmem:[#allocation2 + $0xb8] sm:$0xff] }
  0x4b   :  { %1353 = vmatprep.subr.bf16.mxu0 %v1352_v19  ;;  %1402 = vmatprep.subr.bf16.mxu1 %v1352_v19  ;;  %v95_v7 = vld [vmem:[#allocation2 + $0xc0] sm:$0xff]  ;;  %v96_v8 = vld [vmem:[#allocation2 + $0xc8] sm:$0xff]  ;;  %v97_v9 = vld [vmem:[#allocation2 + $0xd0] sm:$0xff] }
  0x4c   :  { %v98_v10 = vld [vmem:[#allocation2 + $0xd8] sm:$0xff]  ;;  %v99_v11 = vld [vmem:[#allocation2 + $0xe0] sm:$0xff]  ;;  %v100_v12 = vld [vmem:[#allocation2 + $0xe8] sm:$0xff] }
  0x4d   :  { %v101_v13 = vld [vmem:[#allocation2 + $0xf0] sm:$0xff]  ;;  %v102_v14 = vld [vmem:[#allocation2 + $0xf8] sm:$0xff]  ;;  %v103_v15 = vld [vmem:[#allocation2 + $0x100] sm:$0xff] }
  0x4e   :  { %1355 = vmatpush3.bf16.msra.mxu0 %v1352_v19  ;;  %1410 = vmatpush3.bf16.msra.mxu1 %v1352_v19  ;;  %v104_v16 = vld [vmem:[#allocation2 + $0x108] sm:$0xff]  ;;  %v105_v17 = vld [vmem:[#allocation2 + $0x110] sm:$0xff]  ;;  %v106_v18 = vld [vmem:[#allocation2 + $0x118] sm:$0xff] }
  0x4f   :  { %1357 = vmatprep.subr.bf16.mxu0 %v1356_v22  ;;  %1403 = vmatprep.subr.bf16.mxu1 %v1356_v22  ;;  %v107_v19 = vld [vmem:[#allocation2 + $0x120] sm:$0xff]  ;;  %v108_v20 = vld [vmem:[#allocation2 + $0x128] sm:$0xff]  ;;  %v109_v21 = vld [vmem:[#allocation2 + $0x130] sm:$0xff] }
  0x50   :  { %v111_v23 = vld [vmem:[#allocation2 + $0x140] sm:$0xff]  ;;  %v112_v24 = vld [vmem:[#allocation2 + $0x148] sm:$0xff] }
  0x52   :  { %1359 = vmatpush3.bf16.msra.mxu0 %v1356_v22  ;;  %1411 = vmatpush3.bf16.msra.mxu1 %v1356_v22  ;;  %v110_v22 = vld [vmem:[#allocation2 + $0x138] sm:$0xff] }
  0x53   :  { %1361 = vmatprep.subr.bf16.mxu0 %v1360_v25  ;;  %1404 = vmatprep.subr.bf16.mxu1 %v1360_v25 }
  0x56   :  { %1363 = vmatpush3.bf16.msra.mxu0 %v1360_v25  ;;  %1412 = vmatpush3.bf16.msra.mxu1 %v1360_v25  ;;  %v113_v25 = vld [vmem:[#allocation2 + $0x150] sm:$0xff] }
  0x57   :  { %1274 = vmatprep.subr.mxu1 %v1525_v28 }
  0x59   :  { %1179 = vmatmul.mubr.f32.vlgmr.msra.gmra.mrb[0].mxu0 %v72_v26  ;;  %1245 = vmatmul.mubr.f32.vlgmr.msra.gmra.mrb[0].mxu1 %v116_v27  ;;  %v114_v26 = vld [vmem:[#allocation2 + $0x158] sm:$0xff]  ;;  %v765_v27 = vld [vmem:[%s1763_s4] sm:$0xff] }
  0x5a   :  { %1275 = vmatpush3.msra.mxu1 %v681_v29  ;;  %1181 = vmatprep.mubr.f32.mxu0 %v73_v30  ;;  %v766_v29 = vld [vmem:[%s1763_s4 + $0x8] sm:$0xff] }
  0x5b   :  { %1247 = vmatprep.mubr.f32.mxu1 %v117_v31  ;;  %v1365_v30 = vpack.c.bf16 %v766_v29, %v765_v27  ;;  %v1527_v31 = vmov 0.0|0.0  }
  0x5c   :  { %1364 = vmatprep.subr.bf16.mxu1 %v1527_v31 }
  0x5d   :  { %1182 = vmatmul.mubr.f32.gmra.mrb[2].mxu0 %v74_v32  ;;  %1248 = vmatmul.mubr.f32.gmra.mrb[2].mxu1 %v118_v33  ;;  %v767_v32 = vld [vmem:[%s1763_s4 + $0x10] sm:$0xff]  ;;  %v768_v33 = vld [vmem:[%s1763_s4 + $0x18] sm:$0xff] }
  0x5e   :  { %1184 = vmatprep.mubr.f32.mxu0 %v75_v34  ;;  %1250 = vmatprep.mubr.f32.mxu1 %v119_v35  ;;  %v1368_v34 = vpack.c.bf16 %v768_v33, %v767_v32 }
  0x61   :  { %1185 = vmatmul.mubr.f32.gmra.mrb[4].mxu0 %v76_v36  ;;  %1251 = vmatmul.mubr.f32.gmra.mrb[4].mxu1 %v120_v37 }
  0x62   :  { %1187 = vmatprep.mubr.f32.mxu0 %v77_v38  ;;  %1253 = vmatprep.mubr.f32.mxu1 %v121_v39 }
  0x65   :  { %1188 = vmatmul.mubr.f32.gmra.mrb[6].mxu0 %v78_v40  ;;  %1254 = vmatmul.mubr.f32.gmra.mrb[6].mxu1 %v122_v41 }
  0x66   :  { %1190 = vmatprep.mubr.f32.mxu0 %v79_v42  ;;  %1256 = vmatprep.mubr.f32.mxu1 %v123_v43 }
  0x69   :  { %1191 = vmatmul.mubr.f32.gmra.mrb[8].mxu0 %v80_v44  ;;  %1257 = vmatmul.mubr.f32.gmra.mrb[8].mxu1 %v124_v45 }
  0x6a   :  { %1193 = vmatprep.mubr.f32.mxu0 %v81_v46  ;;  %1259 = vmatprep.mubr.f32.mxu1 %v125_v47 }
  0x6d   :  { %1194 = vmatmul.mubr.f32.gmra.mrb[10].mxu0 %v82_v48  ;;  %1260 = vmatmul.mubr.f32.gmra.mrb[10].mxu1 %v126_v49 }
  0x6e   :  { %1196 = vmatprep.mubr.f32.mxu0 %v83_v50  ;;  %1262 = vmatprep.mubr.f32.mxu1 %v127_v51 }
  0x71   :  { %1197 = vmatmul.mubr.f32.gmra.mrb[12].mxu0 %v84_v52  ;;  %1263 = vmatmul.mubr.f32.gmra.mrb[12].mxu1 %v128_v53 }
  0x72   :  { %1199 = vmatprep.mubr.f32.mxu0 %v85_v54  ;;  %1265 = vmatprep.mubr.f32.mxu1 %v129_v55 }
  0x75   :  { %1200 = vmatmul.mubr.f32.gmra.mrb[14].mxu0 %v86_v56  ;;  %1266 = vmatmul.mubr.f32.gmra.mrb[14].mxu1 %v130_v57 }
  0x76   :  { %1202 = vmatprep.mubr.f32.mxu0 %v87_v58  ;;  %1268 = vmatprep.mubr.f32.mxu1 %v131_v59 }
  0x79   :  { %1203 = vmatmul.mubr.f32.gmra.mrb[16].mxu0 %v88_v60  ;;  %1269 = vmatmul.mubr.f32.gmra.mrb[16].mxu1 %v132_v61 }
  0x7a   :  { %1205 = vmatprep.mubr.f32.mxu0 %v89_v62  ;;  %1271 = vmatprep.mubr.f32.mxu1 %v133_v63 }
  0x7d   :  { %1206 = vmatmul.mubr.f32.gmra.mrb[18].mxu0 %v90_v0  ;;  %1272 = vmatmul.mubr.f32.gmra.mrb[18].mxu1 %v134_v1 }
  0x7e   :  { %1208 = vmatprep.mubr.f32.mxu0 %v91_v2  ;;  %1276 = vmatprep.mubr.msk.f32.mxu1 %vm1526_vm0, %v1525_v28 }
  0x81   :  { %1209 = vmatmul.mubr.f32.gmra.mrb[20].mxu0 %v92_v3  ;;  %1277 = vmatmul.mubr.msk.f32.vlgmr.msra.gmra.mrb[20].mxu1 %vm686_vm1, %v680_v4 }
  0x82   :  { %1211 = vmatprep.mubr.f32.mxu0 %v93_v5  ;;  %1287 = vmatprep.mubr.msk.f32.mxu1 %vm1526_vm0, %v1525_v28 }
  0x83   :  { %1366 = vmatpush3.bf16.msra.mxu1 %v1365_v30 }
  0x84   :  { %1367 = vmatprep.subr.bf16.mxu1 %v1527_v31 }
  0x85   :  { %1212 = vmatmul.mubr.f32.gmra.mrb[22].mxu0 %v94_v6 }
  0x86   :  { %1214 = vmatprep.mubr.f32.mxu0 %v95_v7 }
  0x87   :  { %1369 = vmatpush3.bf16.msra.mxu1 %v1368_v34 }
  0x88   :  { %1370 = vmatprep.subr.bf16.mxu1 %v1527_v31 }
  0x89   :  { %1215 = vmatmul.mubr.f32.gmra.mrb[24].mxu0 %v96_v8 }
  0x8a   :  { %1217 = vmatprep.mubr.f32.mxu0 %v97_v9 }
  0x8d   :  { %1218 = vmatmul.mubr.f32.gmra.mrb[26].mxu0 %v98_v10 }
  0x8e   :  { %1220 = vmatprep.mubr.f32.mxu0 %v99_v11 }
  0x91   :  { %1221 = vmatmul.mubr.f32.gmra.mrb[28].mxu0 %v100_v12 }
  0x92   :  { %1223 = vmatprep.mubr.f32.mxu0 %v101_v13 }
  0x95   :  { %1224 = vmatmul.mubr.f32.gmra.mrb[30].mxu0 %v102_v14 }
  0x96   :  { %1226 = vmatprep.mubr.f32.mxu0 %v103_v15 }
  0x99   :  { %1227 = vmatmul.mubr.f32.gmra.mrb[32].mxu0 %v104_v16 }
  0x9a   :  { %1229 = vmatprep.mubr.f32.mxu0 %v105_v17 }
  0x9d   :  { %1230 = vmatmul.mubr.f32.gmra.mrb[34].mxu0 %v106_v18 }
  0x9e   :  { %1232 = vmatprep.mubr.f32.mxu0 %v107_v19 }
  0xa1   :  { %1233 = vmatmul.mubr.f32.gmra.mrb[36].mxu0 %v108_v20  ;;  %v682_v20 = vlaneseq }
  0xa2   :  { %1235 = vmatprep.mubr.f32.mxu0 %v109_v21 }
  0xa3   :  { %v1684_v30 = vshrl.u32 %v682_v20, 7 }
  0xa5   :  { %1236 = vmatmul.mubr.f32.gmra.mrb[38].mxu0 %v110_v22 }
  0xa6   :  { %1238 = vmatprep.mubr.f32.mxu0 %v111_v23 }
  0xa9   :  { %1239 = vmatmul.mubr.f32.gmra.mrb[40].mxu0 %v112_v24 }
  0xaa   :  { %1241 = vmatprep.mubr.f32.mxu0 %v113_v25 }
  0xad   :  { %1242 = vmatmul.mubr.f32.gmra.mrb[42].mxu0 %v114_v26 }
 0x12c   :  { %v1652_v35 = vpop.f32.mrb[0].mxu1  ;;  %v1180_v36 = vpop.f32.mrb[0].mxu0 }
 0x12d   :  { %v1654_v37 = vpop.f32.mrb[1].mxu1  ;;  %v537_v38 = vmax.f32 %v1180_v36, 0.0  ;;  %v217_v39 = vpop.f32.mrb[1].mxu0 }
 0x12e   :  { %v536_v40 = vmax.f32 %v217_v39, 0.0 }
 0x130   :  { %v1656_v41 = vpop.f32.mrb[2].mxu1  ;;  %v600_v42 = vadd.f32 %v537_v38, %v536_v40  ;;  %v1183_v43 = vpop.f32.mrb[2].mxu0 }
 0x131   :  { %v1658_v44 = vpop.f32.mrb[3].mxu1  ;;  %v227_v45 = vpop.f32.mrb[3].mxu0  ;;  %v539_v46 = vmax.f32 %v1183_v43, 0.0  ;;  %v684_v43 = vsub.s32 0, %v1684_v30 }
 0x132   :  { %v538_v47 = vmax.f32 %v227_v45, 0.0 }
 0x134   :  { %v1660_v48 = vpop.f32.mrb[4].mxu1  ;;  %v601_v49 = vadd.f32 %v600_v42, %v538_v47  ;;  %v1186_v50 = vpop.f32.mrb[4].mxu0 }
 0x135   :  { %v1662_v51 = vpop.f32.mrb[5].mxu1  ;;  %v237_v52 = vpop.f32.mrb[5].mxu0  ;;  %v541_v53 = vmax.f32 %v1186_v50, 0.0 }
 0x136   :  { %v540_v54 = vmax.f32 %v237_v52, 0.0  ;;  %v602_v55 = vadd.f32 %v601_v49, %v539_v46  ;;  %v1694_v46 = vld [vmem:[%s1764_s5] sm:$0x7] }
 0x138   :  { %v1664_v56 = vpop.f32.mrb[6].mxu1  ;;  %v603_v57 = vadd.f32 %v602_v55, %v540_v54  ;;  %v1189_v58 = vpop.f32.mrb[6].mxu0 }
 0x139   :  { %v1666_v59 = vpop.f32.mrb[7].mxu1  ;;  %v247_v60 = vpop.f32.mrb[7].mxu0  ;;  %v543_v61 = vmax.f32 %v1189_v58, 0.0 }
 0x13a   :  { %v542_v62 = vmax.f32 %v247_v60, 0.0  ;;  %v604_v63 = vadd.f32 %v603_v57, %v541_v53  ;;  %v685_v57 = vrot.slane %v1694_v46, %v684_v43 }
 0x13c   :  { %v1668_v0 = vpop.f32.mrb[8].mxu1  ;;  %v605_v1 = vadd.f32 %v604_v63, %v542_v62  ;;  %v1192_v2 = vpop.f32.mrb[8].mxu0 }
 0x13d   :  { %v1670_v3 = vpop.f32.mrb[9].mxu1  ;;  %v257_v4 = vpop.f32.mrb[9].mxu0  ;;  %v545_v5 = vmax.f32 %v1192_v2, 0.0 }
 0x13e   :  { %v544_v6 = vmax.f32 %v257_v4, 0.0  ;;  %v606_v7 = vadd.f32 %v605_v1, %v543_v61 }
 0x140   :  { %v1672_v8 = vpop.f32.mrb[10].mxu1  ;;  %v607_v9 = vadd.f32 %v606_v7, %v544_v6  ;;  %v1195_v10 = vpop.f32.mrb[10].mxu0 }
 0x141   :  { %v1674_v11 = vpop.f32.mrb[11].mxu1  ;;  %v267_v12 = vpop.f32.mrb[11].mxu0  ;;  %v547_v13 = vmax.f32 %v1195_v10, 0.0 }
 0x142   :  { %v546_v14 = vmax.f32 %v267_v12, 0.0  ;;  %v608_v15 = vadd.f32 %v607_v9, %v545_v5 }
 0x144   :  { %v1676_v16 = vpop.f32.mrb[12].mxu1  ;;  %v609_v17 = vadd.f32 %v608_v15, %v546_v14  ;;  %v1198_v18 = vpop.f32.mrb[12].mxu0 }
 0x145   :  { %v1678_v19 = vpop.f32.mrb[13].mxu1  ;;  %v277_v21 = vpop.f32.mrb[13].mxu0  ;;  %v549_v22 = vmax.f32 %v1198_v18, 0.0 }
 0x146   :  { %v548_v23 = vmax.f32 %v277_v21, 0.0  ;;  %v610_v24 = vadd.f32 %v609_v17, %v547_v13 }
 0x148   :  { %v1680_v25 = vpop.f32.mrb[14].mxu1  ;;  %v611_v26 = vadd.f32 %v610_v24, %v548_v23  ;;  %v1201_v27 = vpop.f32.mrb[14].mxu0 }
 0x149   :  { %v1682_v29 = vpop.f32.mrb[15].mxu1  ;;  %v287_v32 = vpop.f32.mrb[15].mxu0  ;;  %v551_v33 = vmax.f32 %v1201_v27, 0.0 }
 0x14a   :  { %v550_v34 = vmax.f32 %v287_v32, 0.0  ;;  %v612_v36 = vadd.f32 %v611_v26, %v549_v22 }
 0x14c   :  { %v1686_v38 = vpop.f32.mrb[16].mxu1  ;;  %v613_v39 = vadd.f32 %v612_v36, %v550_v34  ;;  %v1204_v40 = vpop.f32.mrb[16].mxu0 }
 0x14d   :  { %v1688_v42 = vpop.f32.mrb[17].mxu1  ;;  %v297_v45 = vpop.f32.mrb[17].mxu0  ;;  %v553_v47 = vmax.f32 %v1204_v40, 0.0 }
 0x14e   :  { %v552_v49 = vmax.f32 %v297_v45, 0.0  ;;  %v614_v50 = vadd.f32 %v613_v39, %v551_v33 }
 0x150   :  { %v1696_v52 = vpop.f32.mrb[18].mxu1  ;;  %v615_v53 = vadd.f32 %v614_v50, %v552_v49  ;;  %v1207_v54 = vpop.f32.mrb[18].mxu0 }
 0x151   :  { %v1698_v55 = vpop.f32.mrb[19].mxu1  ;;  %v307_v58 = vpop.f32.mrb[19].mxu0  ;;  %v555_v60 = vmax.f32 %v1207_v54, 0.0 }
 0x152   :  { %v554_v61 = vmax.f32 %v307_v58, 0.0  ;;  %v616_v62 = vadd.f32 %v615_v53, %v553_v47 }
 0x154   :  { %v756_v63 = vpop.f32.mrb[20].mxu1  ;;  %v617_v1 = vadd.f32 %v616_v62, %v554_v61  ;;  %v1210_v2 = vpop.f32.mrb[20].mxu0 }
 0x155   :  { %v757_v4 = vadd.f32 %v756_v63, %v685_v57  ;;  %v1278_v5 = vpop.f32.mrb[21].mxu1  ;;  %v317_v6 = vpop.f32.mrb[21].mxu0  ;;  %v557_v7 = vmax.f32 %v1210_v2, 0.0 }
 0x156   :  { %v556_v9 = vmax.f32 %v317_v6, 0.0  ;;  %v618_v10 = vadd.f32 %v617_v1, %v555_v60 }
 0x157   :  { %v760_v12 = vmul.f32 0.5, %v757_v4 }
 0x158   :  { %v619_v13 = vadd.f32 %v618_v10, %v556_v9  ;;  %v1213_v14 = vpop.f32.mrb[22].mxu0 }
 0x159   :  { %1422 = vtanh.f32 %v760_v12  ;;  %v327_v15 = vpop.f32.mrb[23].mxu0  ;;  %v559_v17 = vmax.f32 %v1213_v14, 0.0 }
 0x15a   :  { %v558_v18 = vmax.f32 %v327_v15, 0.0  ;;  %v620_v20 = vadd.f32 %v619_v13, %v557_v7 }
 0x15c   :  { %v621_v21 = vadd.f32 %v620_v20, %v558_v18  ;;  %v1216_v22 = vpop.f32.mrb[24].mxu0 }
 0x15d   :  { %v337_v23 = vpop.f32.mrb[25].mxu0  ;;  %v561_v24 = vmax.f32 %v1216_v22, 0.0 }
 0x15e   :  { %v560_v26 = vmax.f32 %v337_v23, 0.0  ;;  %v622_v27 = vadd.f32 %v621_v21, %v559_v17 }
 0x160   :  { %v623_v32 = vadd.f32 %v622_v27, %v560_v26  ;;  %v1219_v33 = vpop.f32.mrb[26].mxu0 }
 0x161   :  { %v347_v34 = vpop.f32.mrb[27].mxu0  ;;  %v563_v36 = vmax.f32 %v1219_v33, 0.0 }
 0x162   :  { %v562_v39 = vmax.f32 %v347_v34, 0.0  ;;  %v624_v40 = vadd.f32 %v623_v32, %v561_v24 }
 0x163   :  { %v1423_v43 = vpop.eup %1422 }
 0x164   :  { %v762_v45 = vadd.f32 1.0, %v1423_v43  ;;  %v625_v47 = vadd.f32 %v624_v40, %v562_v39  ;;  %v1222_v49 = vpop.f32.mrb[28].mxu0 }
 0x165   :  { %v357_v50 = vpop.f32.mrb[29].mxu0  ;;  %v565_v54 = vmax.f32 %v1222_v49, 0.0 }
 0x166   :  { %v763_v53 = vmul.f32 0.5, %v762_v45  ;;  %v564_v57 = vmax.f32 %v357_v50, 0.0  ;;  %v626_v58 = vadd.f32 %v625_v47, %v563_v36 }
 0x168   :  { %v764_v60 = vmul.f32 %v763_v53, %v757_v4  ;;  %v627_v61 = vadd.f32 %v626_v58, %v564_v57  ;;  %v1225_v62 = vpop.f32.mrb[30].mxu0 }
 0x169   :  { %v367_v63 = vpop.f32.mrb[31].mxu0  ;;  %v567_v1 = vmax.f32 %v1225_v62, 0.0 }
 0x16a   :  { %1288 = vmatmul.mubr.msk.f32.vlgmr.msra.gmra.mrb[22].mxu1 %vm773_vm2, %v764_v60  ;;  %v566_v2 = vmax.f32 %v367_v63, 0.0  ;;  %v628_v5 = vadd.f32 %v627_v61, %v565_v54  ;;  %v580_v63 = vmax.f32 %v1654_v37, 0.0  ;;  %v587_v37 = vmax.f32 %v1664_v56, 0.0 }
 0x16b   :  { %1294 = vmatprep.mubr.msk.f32.mxu1 %vm1526_vm0, %v1525_v28  ;;  %v594_v56 = vmax.f32 %v1682_v29, 0.0  ;;  %v599_v29 = vmax.f32 %v1696_v52, 0.0  ;;  %v869_v52 = vld [vmem:[%s1766_s7 + $0x8] sm:$0xff] }
 0x16c   :  { %v629_v6 = vadd.f32 %v628_v5, %v566_v2  ;;  %v1228_v7 = vpop.f32.mrb[32].mxu0  ;;  %v581_v2 = vmax.f32 %v1652_v35, 0.0  ;;  %v588_v35 = vmax.f32 %v1670_v3, 0.0 }
 0x16d   :  { %v569_v9 = vmax.f32 %v1228_v7, 0.0  ;;  %v377_v10 = vpop.f32.mrb[33].mxu0 }
 0x16e   :  { %v1703_v12 = vadd.f32 %v629_v6, %v567_v1  ;;  %v568_v13 = vmax.f32 %v377_v10, 0.0  ;;  %v582_v6 = vmax.f32 %v1658_v44, 0.0  ;;  %v589_v44 = vmax.f32 %v1668_v0, 0.0 }
 0x16f   :  { %v595_v0 = vmax.f32 %v1680_v25, 0.0 }
 0x170   :  { %v639_v14 = vadd.f32 %v569_v9, %v568_v13  ;;  %v1231_v15 = vpop.f32.mrb[34].mxu0  ;;  %v583_v9 = vmax.f32 %v1656_v41, 0.0  ;;  %v584_v13 = vmax.f32 %v1662_v51, 0.0  ;;  %v590_v41 = vmax.f32 %v1674_v11, 0.0 }
 0x171   :  { %v387_v4 = vpop.f32.mrb[35].mxu0  ;;  %v571_v17 = vmax.f32 %v1231_v15, 0.0  ;;  %v585_v15 = vmax.f32 %v1660_v48, 0.0  ;;  %v591_v51 = vmax.f32 %v1672_v8, 0.0  ;;  %v592_v48 = vmax.f32 %v1678_v19, 0.0 }
 0x172   :  { %v570_v18 = vmax.f32 %v387_v4, 0.0  ;;  %v631_v3 = vrot.slane %v1703_v12, 4  ;;  %v596_v11 = vmax.f32 %v1688_v42, 0.0 }
 0x174   :  { %v640_v20 = vadd.f32 %v639_v14, %v570_v18  ;;  %v1234_v21 = vpop.f32.mrb[36].mxu0 }
 0x175   :  { %v397_v22 = vpop.f32.mrb[37].mxu0  ;;  %v573_v23 = vmax.f32 %v1234_v21, 0.0 }
 0x176   :  { %v572_v24 = vmax.f32 %v397_v22, 0.0  ;;  %v641_v26 = vadd.f32 %v640_v20, %v571_v17  ;;  %v586_v17 = vmax.f32 %v1666_v59, 0.0  ;;  %v593_v59 = vmax.f32 %v1676_v16, 0.0 }
 0x178   :  { %v642_v27 = vadd.f32 %v641_v26, %v572_v24  ;;  %v1237_v32 = vpop.f32.mrb[38].mxu0 }
 0x179   :  { %v407_v33 = vpop.f32.mrb[39].mxu0  ;;  %v575_v34 = vmax.f32 %v1237_v32, 0.0 }
 0x17a   :  { %v574_v36 = vmax.f32 %v407_v33, 0.0  ;;  %v643_v39 = vadd.f32 %v642_v27, %v573_v23 }
 0x17c   :  { %v644_v40 = vadd.f32 %v643_v39, %v574_v36  ;;  %v1240_v43 = vpop.f32.mrb[40].mxu0  ;;  %v597_v36 = vmax.f32 %v1686_v38, 0.0  ;;  %v598_v39 = vmax.f32 %v1698_v55, 0.0  ;;  %v868_v55 = vld [vmem:[%s1766_s7] sm:$0xff]  ;;  %s1528_s7 = smov [#allocation8]  }
 0x17d   :  { %v417_v45 = vpop.f32.mrb[41].mxu0  ;;  %v577_v47 = vmax.f32 %v1240_v43, 0.0  ;;  %s1026_s10 = sshll.u32 %s1528_s7, 4  ;;  %s1027_s10 = int_to_ptr.vmem [resolvable:$true] %s1026_s10 }
 0x17e   :  { %v576_v49 = vmax.f32 %v417_v45, 0.0  ;;  %v645_v50 = vadd.f32 %v644_v40, %v575_v34  ;;  %v632_v34 = vadd.f32 %v631_v3, %v1703_v12  ;;  %v866_v3 = vld [vmem:[#allocation7 + $0x70] sm:$0xff]  ;;  %s1492_s11 = scalar_lea.vmem %s1027_s10, 32  ;;  %p1497_p11 = scmp.lt.s32.totalorder %s1027_s10, %s1027_s10 }
 0x17f   :  { %p1493_p10 = scmp.ne.s32.totalorder %s1027_s10, %s1492_s11  ;;  %p1498_p12 = scmp.lt.s32.totalorder %s1492_s11, %s1492_s11 }
 0x180   :  { %v646_v53 = vadd.f32 %v645_v50, %v576_v49  ;;  %v1243_v54 = vpop.f32.mrb[42].mxu0  ;;  %v633_v16 = vrot.slane %v632_v34, 2 }
 0x181   :  { %v427_v57 = vpop.f32.mrb[43].mxu0  ;;  %v579_v58 = vmax.f32 %v1243_v54, 0.0  ;;  %p1499_p13 = por %p1498_p12, %p1497_p11 }
 0x182   :  { %v578_v60 = vmax.f32 %v427_v57, 0.0  ;;  %v647_v61 = vadd.f32 %v646_v53, %v577_v47  ;;  %v634_v45 = vadd.f32 %v633_v16, %v632_v34  ;;  %v1016_v34 = vsub.s32 2, %v1684_v30 }
 0x183   :  { %p1500_p0 = pnand %p1499_p13, %p1493_p10 }
 0x184   :  { %v648_v62 = vadd.f32 %v647_v61, %v578_v60  ;;  %v635_v25 = vrot.slane %v634_v45, 1  ;;  %v1371_v61 = vpack.c.bf16 %v869_v52, %v868_v55 }
 0x186   :  { %v649_v1 = vadd.f32 %v648_v62, %v579_v58  ;;  %v636_v42 = vadd.f32 %v635_v25, %v634_v45  ;;  %1372 = vmatpush3.bf16.msra.mxu1 %v1371_v61  ;;  %v771_v62 = vsub.s32 1, %v1684_v30 }
 0x187   :  { %1373 = vmatprep.subr.bf16.mxu1 %v1527_v31 }
 0x188   :  { %v650_v5 = vadd.f32 %v649_v1, %v580_v63  ;;  %v638_v57 = vmul.f32 0.00390625, %v636_v42  ;;  %v772_v63 = vrot.slane %v1694_v46, %v771_v62 }
 0x18a   :  { %v651_v7 = vadd.f32 %v650_v5, %v581_v2 }
 0x18c   :  { %v652_v10 = vadd.f32 %v651_v7, %v582_v6 }
 0x18e   :  { %v653_v14 = vadd.f32 %v652_v10, %v583_v9  ;;  %v852_v10 = vld [vmem:[#allocation7] sm:$0xff] }
 0x190   :  { %v654_v4 = vadd.f32 %v653_v14, %v584_v13  ;;  %v853_v13 = vld [vmem:[#allocation7 + $0x8] sm:$0xff] }
 0x192   :  { %v655_v18 = vadd.f32 %v654_v4, %v585_v15  ;;  %v1374_v15 = vpack.c.bf16 %v853_v13, %v852_v10 }
 0x194   :  { %v656_v20 = vadd.f32 %v655_v18, %v586_v17  ;;  %v854_v17 = vld [vmem:[#allocation7 + $0x10] sm:$0xff]  ;;  %v855_v18 = vld [vmem:[#allocation7 + $0x18] sm:$0xff] }
 0x196   :  { %v657_v21 = vadd.f32 %v656_v20, %v587_v37  ;;  %v1377_v37 = vpack.c.bf16 %v855_v18, %v854_v17  ;;  %v856_v20 = vld [vmem:[#allocation7 + $0x20] sm:$0xff] }
 0x198   :  { %v658_v22 = vadd.f32 %v657_v21, %v588_v35  ;;  %v857_v35 = vld [vmem:[#allocation7 + $0x28] sm:$0xff] }
 0x199   :  { %v1380_v21 = vpack.c.bf16 %v857_v35, %v856_v20 }
 0x19a   :  { %v659_v23 = vadd.f32 %v658_v22, %v589_v44  ;;  %v858_v44 = vld [vmem:[#allocation7 + $0x30] sm:$0xff]  ;;  %v859_v22 = vld [vmem:[#allocation7 + $0x38] sm:$0xff] }
 0x19c   :  { %v660_v24 = vadd.f32 %v659_v23, %v590_v41  ;;  %v1383_v41 = vpack.c.bf16 %v859_v22, %v858_v44  ;;  %v860_v23 = vld [vmem:[#allocation7 + $0x40] sm:$0xff] }
 0x19e   :  { %v661_v26 = vadd.f32 %v660_v24, %v591_v51  ;;  %v861_v51 = vld [vmem:[#allocation7 + $0x48] sm:$0xff] }
 0x19f   :  { %v1386_v24 = vpack.c.bf16 %v861_v51, %v860_v23 }
 0x1a0   :  { %v662_v27 = vadd.f32 %v661_v26, %v592_v48  ;;  %v863_v48 = vld [vmem:[#allocation7 + $0x58] sm:$0xff] }
 0x1a2   :  { %v663_v32 = vadd.f32 %v662_v27, %v593_v59  ;;  %v864_v59 = vld [vmem:[#allocation7 + $0x60] sm:$0xff]  ;;  %v865_v27 = vld [vmem:[#allocation7 + $0x68] sm:$0xff] }
 0x1a4   :  { %v664_v33 = vadd.f32 %v663_v32, %v594_v56  ;;  %v1392_v56 = vpack.c.bf16 %v865_v27, %v864_v59  ;;  %v867_v32 = vld [vmem:[#allocation7 + $0x78] sm:$0xff] }
 0x1a6   :  { %v665_v8 = vadd.f32 %v664_v33, %v595_v0  ;;  %v1395_v0 = vpack.c.bf16 %v867_v32, %v866_v3 }
 0x1a8   :  { %v666_v19 = vadd.f32 %v665_v8, %v596_v11  ;;  %v1017_v8 = vrot.slane %v1694_v46, %v1016_v34 }
 0x1aa   :  { %v667_v40 = vadd.f32 %v666_v19, %v597_v36 }
 0x1ac   :  { %v668_v43 = vadd.f32 %v667_v40, %v598_v39 }
 0x1ae   :  { %v669_v47 = vadd.f32 %v668_v43, %v599_v29 }
 0x1b0   :  { %v670_v49 = vrot.slane %v669_v47, 4 }
 0x1b2   :  { %v671_v50 = vadd.f32 %v670_v49, %v669_v47 }
 0x1b4   :  { %v672_v53 = vrot.slane %v671_v50, 2 }
 0x1b6   :  { %v673_v54 = vadd.f32 %v672_v53, %v671_v50 }
 0x1b8   :  { %v674_v12 = vrot.slane %v673_v54, 1 }
 0x1ba   :  { %v675_v58 = vadd.f32 %v674_v12, %v673_v54 }
 0x1bc   :  { %v676_v38 = vmul.f32 0.00390625, %v675_v58 }
 0x1be   :  { %v678_v60 = vsel %vm677_vm3, %v638_v57, %v676_v38 }
 0x23d   :  { %v843_v1 = vpop.f32.mrb[22].mxu1 }
 0x23e   :  { %v844_v2 = vadd.f32 %v843_v1, %v772_v63  ;;  %v1289_v5 = vpop.f32.mrb[23].mxu1 }
 0x240   :  { %v847_v6 = vmul.f32 0.5, %v844_v2 }
 0x242   :  { %1424 = vtanh.f32 %v847_v6 }
 0x24c   :  { %v1425_v7 = vpop.eup %1424 }
 0x24d   :  { %v849_v9 = vadd.f32 1.0, %v1425_v7 }
 0x24f   :  { %v850_v14 = vmul.f32 0.5, %v849_v9 }
 0x251   :  { %v851_v4 = vmul.f32 %v850_v14, %v844_v2 }
 0x253   :  { %1295 = vmatmul.mubr.msk.f32.vlgmr.msra.gmra.mrb[24].mxu1 %vm870_vm4, %v851_v4 }
 0x254   :  { %1375 = vmatpush3.bf16.msra.mxu1 %v1374_v15  ;;  %1329 = vmatprep.mubr.msk.f32.mxu1 %vm1526_vm0, %v1525_v28  ;;  %v862_v28 = vld [vmem:[#allocation7 + $0x50] sm:$0xff] }
 0x255   :  { %1376 = vmatprep.subr.bf16.mxu1 %v1527_v31  ;;  %v1389_v26 = vpack.c.bf16 %v863_v48, %v862_v28 }
 0x258   :  { %1378 = vmatpush3.bf16.msra.mxu1 %v1377_v37 }
 0x259   :  { %1379 = vmatprep.subr.bf16.mxu1 %v1527_v31 }
 0x25c   :  { %1381 = vmatpush3.bf16.msra.mxu1 %v1380_v21 }
 0x25d   :  { %1382 = vmatprep.subr.bf16.mxu1 %v1527_v31 }
 0x260   :  { %1384 = vmatpush3.bf16.msra.mxu1 %v1383_v41 }
 0x261   :  { %1385 = vmatprep.subr.bf16.mxu1 %v1527_v31 }
 0x264   :  { %1387 = vmatpush3.bf16.msra.mxu1 %v1386_v24 }
 0x265   :  { %1388 = vmatprep.subr.bf16.mxu1 %v1527_v31 }
 0x268   :  { %1390 = vmatpush3.bf16.msra.mxu1 %v1389_v26 }
 0x269   :  { %1391 = vmatprep.subr.bf16.mxu1 %v1527_v31 }
 0x26c   :  { %1393 = vmatpush3.bf16.msra.mxu1 %v1392_v56 }
 0x26d   :  { %1394 = vmatprep.subr.bf16.mxu1 %v1527_v31 }
 0x270   :  { %1396 = vmatpush3.bf16.msra.mxu1 %v1395_v0 }
 0x273   :  { %1330 = vmatmul.mubr.f32.vlgmr.msra.gmra.mrb[26].mxu1 %v678_v60 }
 0x326   :  { %v940_v33 = vpop.f32.mrb[24].mxu1 }
 0x327   :  { %v1296_v11 = vpop.f32.mrb[25].mxu1 }
 0x346   :  { %v1010_v36 = vpop.f32.mrb[26].mxu1 }
 0x347   :  { %v1011_v19 = vadd.f32 %v1010_v36, %v940_v33  ;;  %v1331_v39 = vpop.f32.mrb[27].mxu1 }
 0x349   :  { %v1018_v16 = vadd.f32 %v1017_v8, %v1011_v19 }
 0x34b   :  { %1019 = vst [vmem:[#allocation8] sm:$0x3] %v1018_v16 }
 0x34c   :  { %1503 = shalt.err (!%p1500_p0)
}
 0x34d   :  { %s1504_s14 = scalar_lea.hbm %s1767_s8, 32 }
 0x34e   :  { %p1505_p1 = scmp.ne.s32.totalorder %s1767_s8, %s1504_s14  ;;  %p1508_p2 = scmp.lt.u32.totalorder %s1504_s14, %s1767_s8 }
 0x350   :  { %p1510_p3 = pnand %p1508_p2, %p1505_p1 }
 0x352   :  { %1513 = shalt.err (!%p1510_p3)
}
 0x353   :  { %1029 = dma.vmem_to_hbm [thread:$0]  %s1027_s10, 32, %s1767_s8, [#allocation4]  }
 0x354   :  { %1518 = dma.done.wait [#allocation4], 32  }
 0x355   :  { %1519 = vsyncadd [#allocation4], 4294967264 }
 0x356   :  { %1033 = vsyncpa [#allocation3], 1 }
 0x357   :  { %1034 = vsyncpa [#allocation6], 1 }
 0x358   :  { %1035 = vsyncpa [#allocation4], 1 }

</bundles_post_ra>
